<compile_context>
chip_gen: v6e
topology: v6e:2x2x1
jax: 0.10.0
libtpu: 0.0.40
codegen_flags: <defaults>
</compile_context>

<pallas_src>
import math

import jax
import jax.numpy as jnp
from jax.experimental import pallas as pl
from jax.experimental.pallas import tpu as pltpu


def mlp_kernel(x_ref, w1_ref, b1_ref, w2_ref, b2_ref, o_ref):
    """One batch tile.

    x_ref : (TB, Din)  streamed activations (f32 or bf16)
    w1_ref: (H, Din)   fc1.weight (PyTorch layout), VMEM-resident across grid steps
    b1_ref: (H, 1)     fc1.bias as a column (broadcasts over batch lanes), f32
    w2_ref: (1, H)     fc2.weight (PyTorch layout), f32, VMEM-resident
    b2_ref: (1,)       fc2.bias scalar in SMEM
    o_ref : (1, TB)    lane-dense sigmoid outputs for this batch tile
    """
    # fc1 in (feature, batch) orientation: hT = W1 @ x^T, contracting Din of both
    # operands directly on the MXU (no explicit XLU transpose of the activation tile).
    hT = jax.lax.dot_general(
        w1_ref[...], x_ref[...],
        dimension_numbers=(((1,), (1,)), ((), ())),
        preferred_element_type=jnp.float32,
    )                                                    # (H, TB), f32 accumulation
    hT = jnp.maximum(hT + b1_ref[...], 0.0)              # bias + ReLU on the VPU (f32)

    # fc2: (1, H) @ (H, TB) on the MXU -> lane-dense logits row.
    logits = jnp.dot(w2_ref[...], hT, preferred_element_type=jnp.float32)
    logits = logits + b2_ref[0]                          # scalar bias from SMEM

    # Exact sigmoid: exp rides the EUP; the single-row f32 divide is negligible.
    o_ref[...] = (1.0 / (1.0 + jnp.exp(-logits))).astype(o_ref.dtype)


def mlp_forward(x, w1, b1, w2, b2, *, block_b=512):
    """Fused MLP forward: sigmoid(relu(x @ w1.T + b1) @ w2.T + b2).

    x : (B, input_size), float32 or bfloat16 (bf16 halves the streamed HBM bytes).
    w1: (hidden, input_size)   -- PyTorch fc1.weight layout
    b1: (hidden,) or (hidden, 1)
    w2: (1, hidden)            -- PyTorch fc2.weight layout
    b2: (1,) or scalar
    Returns (B, 1) float32 probabilities.
    """
    B, d_in = x.shape
    hidden = w1.shape[0]
    assert block_b >= 128 and block_b % 128 == 0

    w1 = w1.reshape(hidden, d_in).astype(x.dtype)        # MXU operand matches x dtype
    b1 = jnp.asarray(b1, jnp.float32).reshape(hidden, 1)
    w2 = jnp.asarray(w2, jnp.float32).reshape(1, hidden)
    b2 = jnp.asarray(b2, jnp.float32).reshape(1)

    # Batch tile: a multiple of 128 (lane-dense output stores) that divides the
    # lane-rounded batch extent, so no whole grid step is wasted on padding and x is
    # never padded/copied in HBM. The ragged edge (<128 rows) is masked by Pallas.
    b128 = 128 * pl.cdiv(B, 128)
    tb = 128
    for cand in range(256, min(block_b, b128) + 1, 128):
        if b128 % cand == 0:
            tb = cand
    grid = (b128 // tb,)
    # NOTE(v7x): with 2 TensorCores, prefer a tb that keeps len(grid) even when B is
    # large; on v5e/v6e (1 TC) this is a no-op. Weight specs could also use
    # pipeline_mode=pl.Buffered(1) to trim their redundant double buffer (a few KiB).

    out_row = pl.pallas_call(
        mlp_kernel,
        out_shape=jax.ShapeDtypeStruct((1, b128), jnp.float32),
        grid=grid,
        in_specs=[
            pl.BlockSpec((tb, d_in), lambda i: (i, 0)),          # x: streamed over batch
            pl.BlockSpec((hidden, d_in), lambda i: (0, 0)),      # w1: VMEM-resident
            pl.BlockSpec((hidden, 1), lambda i: (0, 0)),         # b1: VMEM-resident
            pl.BlockSpec((1, hidden), lambda i: (0, 0)),         # w2: VMEM-resident
            pl.BlockSpec(memory_space=pltpu.MemorySpace.SMEM),   # b2: scalar in SMEM
        ],
        out_specs=pl.BlockSpec((1, tb), lambda i: (0, i)),       # lane-dense output row
        compiler_params=pltpu.CompilerParams(
            dimension_semantics=("parallel",),                   # megacore sharding (v7x)
        ),
    )(x, w1, b1, w2, b2)

    return out_row[:, :B].reshape(B, 1)


def init_params(key, input_size, hidden_size):
    """torch.nn.Linear-style init: weight (out, in), bias (out,), U(+/-1/sqrt(fan_in))."""
    k1, k2, k3, k4 = jax.random.split(key, 4)
    bound1 = 1.0 / math.sqrt(input_size)
    bound2 = 1.0 / math.sqrt(hidden_size)
    w1 = jax.random.uniform(k1, (hidden_size, input_size), jnp.float32, -bound1, bound1)
    b1 = jax.random.uniform(k2, (hidden_size,), jnp.float32, -bound1, bound1)
    w2 = jax.random.uniform(k3, (1, hidden_size), jnp.float32, -bound2, bound2)
    b2 = jax.random.uniform(k4, (1,), jnp.float32, -bound2, bound2)
    return w1, b1, w2, b2


def mlp_reference(x, w1, b1, w2, b2):
    """Pure-JAX reference (high-precision matmuls) of the same forward pass."""
    hp = jax.lax.Precision.HIGHEST
    h = jnp.maximum(jnp.dot(x, w1.T, precision=hp) + b1.reshape(1, -1), 0.0)
    z = jnp.dot(h, w2.T, precision=hp) + b2.reshape(1, -1)
    return 1.0 / (1.0 + jnp.exp(-z))


if __name__ == "__main__":
    input_size, hidden_size = 16, 32

    key = jax.random.PRNGKey(0)
    kx, kx2, kp = jax.random.split(key, 3)
    w1, b1, w2, b2 = init_params(kp, input_size, hidden_size)

    # Case 1: f32 activations, batch multiple of 128, small tile -> grid=(3,)
    # (exercises multi-step pipelining with VMEM-resident weights; no padding).
    B1 = 384
    x1 = jax.random.normal(kx, (B1, input_size), jnp.float32)
    out1 = mlp_forward(x1, w1, b1, w2, b2, block_b=128)
    jax.block_until_ready(out1)
    ref1 = mlp_reference(x1, w1, b1, w2, b2)
    assert out1.shape == (B1, 1)
    assert jnp.allclose(out1, ref1, atol=3e-3), "f32 multi-tile output mismatch"

    # Case 2: ragged batch (not a multiple of 128): no jnp.pad HBM copy; the edge
    # block is handled by Pallas partial-block masking.
    B2 = 200
    x2 = jax.random.normal(kx2, (B2, input_size), jnp.float32)
    out2 = mlp_forward(x2, w1, b1, w2, b2)
    jax.block_until_ready(out2)
    ref2 = mlp_reference(x2, w1, b1, w2, b2)
    assert out2.shape == (B2, 1)
    assert jnp.allclose(out2, ref2, atol=3e-3), "ragged-batch output mismatch"

    # Case 3: bf16-streamed activations (halves x's HBM traffic at large B); the MXU
    # consumes bf16 with f32 accumulation, post-matmul math stays f32. The reference
    # uses the same bf16-rounded operands so only accumulation rounding differs.
    xb = x1.astype(jnp.bfloat16)
    out3 = mlp_forward(xb, w1, b1, w2, b2)
    jax.block_until_ready(out3)
    ref3 = mlp_reference(xb.astype(jnp.float32),
                         w1.astype(jnp.bfloat16).astype(jnp.float32), b1, w2, b2)
    assert out3.shape == (B1, 1)
    assert jnp.allclose(out3, ref3, atol=3e-3), "bf16-activation output mismatch"

    print("KERNEL_OK")
</pallas_src>

<mosaic_0001>
module attributes {stable_mosaic.version = 11 : i64} {
  func.func @mlp_kernel(%arg0: i32, %arg1: memref<128x16xf32, #tpu.memory_space<vmem>>, %arg2: memref<32x16xf32, #tpu.memory_space<vmem>>, %arg3: memref<32x1xf32, #tpu.memory_space<vmem>>, %arg4: memref<1x32xf32, #tpu.memory_space<vmem>>, %arg5: memref<1xf32, #tpu.memory_space<smem>>, %arg6: memref<1x128xf32, #tpu.memory_space<vmem>>) attributes {dimension_semantics = [#tpu.dimension_semantics<parallel>], iteration_bounds = array<i64: 3>, scalar_prefetch = 0 : i64, scratch_operands = 0 : i64, tpu.core_type = #tpu.core_type<tc>, window_params = [{transform_indices = @transform_0, window_bounds = array<i64: 128, 16>}, {pipeline_mode = #tpu.pipeline_mode<synchronous>, transform_indices = @transform_1, window_bounds = array<i64: 32, 16>}, {pipeline_mode = #tpu.pipeline_mode<synchronous>, transform_indices = @transform_2, window_bounds = array<i64: 32, 1>}, {pipeline_mode = #tpu.pipeline_mode<synchronous>, transform_indices = @transform_3, window_bounds = array<i64: 1, 32>}, {transform_indices = @transform_4, window_bounds = array<i64: 1>}, {transform_indices = @transform_5, window_bounds = array<i64: 1, 128>}]} {
    %c0 = arith.constant 0 : index
    %c0_0 = arith.constant 0 : index
    %0 = vector.load %arg2[%c0, %c0_0] : memref<32x16xf32, #tpu.memory_space<vmem>>, vector<32x16xf32>
    %c0_1 = arith.constant 0 : index
    %c0_2 = arith.constant 0 : index
    %1 = vector.load %arg1[%c0_1, %c0_2] : memref<128x16xf32, #tpu.memory_space<vmem>>, vector<128x16xf32>
    %cst = arith.constant dense<0.000000e+00> : vector<32x128xf32>
    %2 = tpu.matmul %0, %1, %cst {dimension_numbers = #tpu.dot_dimension_numbers<[1], [1], [0], [0], [0, 0, 1, 0], [], []>} : vector<32x16xf32>, vector<128x16xf32>, vector<32x128xf32> -> vector<32x128xf32>
    %c0_3 = arith.constant 0 : index
    %c0_4 = arith.constant 0 : index
    %3 = vector.load %arg3[%c0_3, %c0_4] : memref<32x1xf32, #tpu.memory_space<vmem>>, vector<32x1xf32>
    %4 = vector.broadcast %3 : vector<32x1xf32> to vector<32x128xf32>
    %5 = arith.addf %2, %4 : vector<32x128xf32>
    %cst_5 = arith.constant 0.000000e+00 : f32
    %6 = vector.broadcast %cst_5 : f32 to vector<32x128xf32>
    %7 = arith.maximumf %5, %6 : vector<32x128xf32>
    %c0_6 = arith.constant 0 : index
    %c0_7 = arith.constant 0 : index
    %8 = vector.load %arg4[%c0_6, %c0_7] : memref<1x32xf32, #tpu.memory_space<vmem>>, vector<1x32xf32>
    %cst_8 = arith.constant dense<0.000000e+00> : vector<1x128xf32>
    %9 = tpu.matmul %8, %7, %cst_8 {dimension_numbers = #tpu.dot_dimension_numbers<[1], [0], [0], [1], [0, 0, 1, 1], [], []>} : vector<1x32xf32>, vector<32x128xf32>, vector<1x128xf32> -> vector<1x128xf32>
    %c0_9 = arith.constant 0 : index
    %10 = memref.load %arg5[%c0_9] : memref<1xf32, #tpu.memory_space<smem>>
    %11 = vector.broadcast %10 : f32 to vector<1x128xf32>
    %12 = arith.addf %9, %11 : vector<1x128xf32>
    %cst_10 = arith.constant 0.000000e+00 : f32
    %13 = vector.broadcast %cst_10 : f32 to vector<1x128xf32>
    %14 = arith.subf %13, %12 : vector<1x128xf32>
    %15 = math.exp %14 : vector<1x128xf32>
    %cst_11 = arith.constant 1.000000e+00 : f32
    %16 = vector.broadcast %cst_11 : f32 to vector<1x128xf32>
    %17 = arith.addf %16, %15 : vector<1x128xf32>
    %cst_12 = arith.constant 1.000000e+00 : f32
    %18 = vector.broadcast %cst_12 : f32 to vector<1x128xf32>
    %19 = arith.divf %18, %17 : vector<1x128xf32>
    %c0_13 = arith.constant 0 : index
    %c0_14 = arith.constant 0 : index
    %20 = vector.load %arg6[%c0_13, %c0_14] : memref<1x128xf32, #tpu.memory_space<vmem>>, vector<1x128xf32>
    tpu.vector_store %arg6[%c0_13, %c0_14], %19 {strides = array<i32>} : memref<1x128xf32, #tpu.memory_space<vmem>>, vector<1x128xf32>,
    return
  }
  func.func @transform_0(%arg0: i32) -> (i32, i32) {
    %c0_i32 = arith.constant 0 : i32
    %c0_i32_0 = arith.constant 0 : i32
    return %arg0, %c0_i32 : i32, i32
  }
  func.func @transform_1(%arg0: i32) -> (i32, i32) {
    %c0_i32 = arith.constant 0 : i32
    %c0_i32_0 = arith.constant 0 : i32
    %c0_i32_1 = arith.constant 0 : i32
    return %c0_i32, %c0_i32_0 : i32, i32
  }
  func.func @transform_2(%arg0: i32) -> (i32, i32) {
    %c0_i32 = arith.constant 0 : i32
    %c0_i32_0 = arith.constant 0 : i32
    %c0_i32_1 = arith.constant 0 : i32
    return %c0_i32, %c0_i32_0 : i32, i32
  }
  func.func @transform_3(%arg0: i32) -> (i32, i32) {
    %c0_i32 = arith.constant 0 : i32
    %c0_i32_0 = arith.constant 0 : i32
    %c0_i32_1 = arith.constant 0 : i32
    return %c0_i32, %c0_i32_0 : i32, i32
  }
  func.func @transform_4(%arg0: i32) -> i32 {
    %c0_i32 = arith.constant 0 : i32
    %c0_i32_0 = arith.constant 0 : i32
    return %c0_i32 : i32
  }
  func.func @transform_5(%arg0: i32) -> (i32, i32) {
    %c0_i32 = arith.constant 0 : i32
    %c0_i32_0 = arith.constant 0 : i32
    return %c0_i32, %arg0 : i32, i32
  }
}

</mosaic_0001>

<bundles_post_ra>
// kernel: tpu_custom_call.1
= control target key start
LH: loop header
LB: loop body
LE: loop exit
PB: predicated region body
PF: predicated region fallthrough
CT: control target
= control target key end

     0   :  { %s995_s0 = inlined_call_operand.vmem [shape: f32[384,16], index: 0, kind: input, shape index: {}]   ;;  %s996_s1 = inlined_call_operand.vmem [shape: f32[32,16], index: 1, kind: input, shape index: {}]   ;;  %s997_s2 = inlined_call_operand.vmem [shape: f32[32,1], index: 2, kind: input, shape index: {}]   ;;  %s998_s3 = inlined_call_operand.vmem [shape: f32[1,32], index: 3, kind: input, shape index: {}]   ;;  %s999_s4 = inlined_call_operand.<no memory space> [shape: f32[1], index: 4, kind: input, shape index: {}]   ;;  %s1000_s5 = inlined_call_operand.hbm [shape: f32[1,384], index: 5, kind: output, shape index: {}]  }
   0x1   :  { %10 = sst [smem:[#allocation2]] %s999_s4 }
   0x2   :  { %11 = vsyncpa [#allocation4], 0 }
   0x3   :  { %13 = vsyncpa [#allocation4 + $0x1], 0  ;;  %s822_s20 = smov 0   ;;  %s824_s21 = smov 0  }
   0x4   :  { %s826_s22 = smov 0   ;;  %s828_s23 = smov 0  }
   0x5 LB: > { %s570_s4 = sadd.s32 4294967295, %s783_s23   ;;  %s571_s24 = sadd.s32 4294967294, %s783_s23   ;;  %s783_s23 = sphi %s828_s23, %s1006_s23   ;;  %s779_s22 = sphi %s826_s22, %s1005_s22   ;;  %s775_s21 = sphi %s824_s21, %s1004_s21   ;;  %s771_s20 = sphi %s822_s20, %s1003_s20  }
   0x6   : > { %s845_s25 = sadd.s32 1, %s783_s23   ;;  %s136_s26 = sadd.s32 1, %s779_s22 }
   0x7   : > { %s133_s27 = ssub.s32 %s783_s23, %s845_s25  ;;  %p146_p0 = scmp.ne.s32.totalorder %s779_s22, %s775_s21 }
   0x8   : > { %p134_p1 = scmp.eq.s32.totalorder %s133_s27, 0  ;;  %p147_p2 = scmp.eq.s32.totalorder %s570_s4, 2 }
   0x9   : > { %p152_p3 = scmp.ne.s32.totalorder %s775_s21, %s771_s20  ;;  %p153_p4 = scmp.eq.s32.totalorder %s571_s24, 2 }
   0xa   : > { %s855_s28 = scalar_select %p134_p1, %s779_s22, %s136_s26  }
   0xb   : > { %p857_p5 = por %p147_p2, %p146_p0  ;;  %p861_p6 = por %p153_p4, %p152_p3 }
   0xc   : > { %p574_p7 = scmp.ge.s32.totalorder %s783_s23, 1  ;;  %p192_p8 = scmp.lt.s32.totalorder %s783_s23, 4 }
   0xe   : > { %p193_p9 = pnand %p574_p7, %p192_p8 }
   0xf   : > { %s867_s6 = sshll.u32 (!%p193_p9), %s570_s4, 4  ;;  %s217_s14 = sand.u32 (!%p193_p9), 1, %s775_s21  }
  0x10   : > { %196 = sbr.rel (%p193_p9) target bundleno = 540 (0x21c), region = 40  ;;  %p220_p10 = scmp.lt.s32.totalorder (!%p193_p9), %s867_s6, 47 }
  0x11   : > { %s218_s15 = scalar_lea.vmem (!%p193_p9), [#allocation3], %s217_s14  ;;  %s960_s19 = scalar_lea.hbm (!%p193_p9), %s1000_s5, %s867_s6 }
  0x12   : > { %s516_s16 = sshll.u32 (!%p193_p9), %s218_s15, 4  ;;  %s504_s4 = scalar_lea.sflag (!%p193_p9), [#allocation4], %s217_s14  ;;  %s517_s16 = int_to_ptr.vmem [resolvable:$true] %s516_s16 }
  0x13   : > { %s788_s26 = smov (!%p193_p9), [#allocation3]  }
  0x14   : > { %s727_s27 = sshll.u32 (!%p193_p9), %s788_s26, 4  ;;  %s728_s27 = int_to_ptr.vmem [resolvable:$false] %s727_s27 }
  0x15   : > { %vm269_vm0 = vcmask 130048   ;;  %v225_v0 = vld [vmem:[%s996_s1] sm:$0xff]  ;;  %v785_v1 = vmov 0   ;;  %v248_v2 = vld [vmem:[%s997_s2 + $0x18] sm:$0xff]  ;;  %v246_v3 = vld [vmem:[%s997_s2 + $0x8] sm:$0xff]  ;;  %s221_s13 = scalar_select %p220_p10, %s867_s6, 47 }
  0x16   : > { %658 = vmatprep.mubr.msk.f32.mxu0 %vm269_vm0, %v225_v0  ;;  %718 = vset.pattern.permute.xlu1 %v785_v1  ;;  %v245_v4 = vld [vmem:[%s997_s2] sm:$0xff]  ;;  %v247_v5 = vld [vmem:[%s997_s2 + $0x10] sm:$0xff]  ;;  %v226_v22 = vld [vmem:[%s996_s1 + $0x8] sm:$0xff]  ;;  %v786_v25 = vmov 0.0   ;;  %vm787_vm1 = vmmov 0   ;;  %vm422_vm2 = vcmask 261120   ;;  %p730_p0 = scmp.lt.s32.totalorder %s517_s16, %s728_s27 }
  0x17   : > { %717 = vset.pattern.permute.xlu0 %v785_v1  ;;  %256 = vperm.xlu1 %718, %v246_v3   ;;  %s576_s18 = sshll.u32 %s221_s13, 3  ;;  %v227_v23 = vld [vmem:[%s996_s1 + $0x10] sm:$0xff]  ;;  %v228_v24 = vld [vmem:[%s996_s1 + $0x18] sm:$0xff]  ;;  %v419_v42 = vld [vmem:[%s998_s3] sm:$0x1]  ;;  %s420_s13 = sld [smem:[#allocation2]] }
  0x18   : > { %266 = vperm.xlu0 %717, %v248_v2   ;;  %s890_s24 = scalar_lea.vmem %s995_s0, %s576_s18  ;;  %664 = vmatprep.subr.mxu1 %v786_v25  ;;  %s729_s7 = scalar_lea.vmem %s728_s27, 32 }
  0x19   : > { %v244_v6 = vld [vmem:[%s890_s24 + $0x78] sm:$0xff]  ;;  %v243_v7 = vld [vmem:[%s890_s24 + $0x70] sm:$0xff]  ;;  %v242_v8 = vld [vmem:[%s890_s24 + $0x68] sm:$0xff]  ;;  %672 = vmatprep.mubr.msk.f32.mxu1 %vm787_vm1, %v786_v25 }
  0x1a   : > { %626 = vmatprep.subr.msk.mxu0 %vm269_vm0, %v244_v6  ;;  %v241_v9 = vld [vmem:[%s890_s24 + $0x60] sm:$0xff]  ;;  %v240_v10 = vld [vmem:[%s890_s24 + $0x58] sm:$0xff]  ;;  %v239_v11 = vld [vmem:[%s890_s24 + $0x50] sm:$0xff] }
  0x1b   : > { %251 = vperm.xlu1 %718, %v245_v4   ;;  %627 = vmatpush3.xpose.msk.msra.mxu0 %vm269_vm0, %v244_v6  ;;  %v238_v12 = vld [vmem:[%s890_s24 + $0x48] sm:$0xff]  ;;  %v237_v13 = vld [vmem:[%s890_s24 + $0x40] sm:$0xff]  ;;  %v236_v14 = vld [vmem:[%s890_s24 + $0x38] sm:$0xff] }
  0x1c   : > { %261 = vperm.xlu0 %717, %v247_v5   ;;  %628 = vmatprep.subr.msk.mxu0 %vm269_vm0, %v243_v7  ;;  %v235_v15 = vld [vmem:[%s890_s24 + $0x30] sm:$0xff]  ;;  %v234_v16 = vld [vmem:[%s890_s24 + $0x28] sm:$0xff]  ;;  %v233_v17 = vld [vmem:[%s890_s24 + $0x20] sm:$0xff] }
  0x1d   : > { %v232_v18 = vld [vmem:[%s890_s24 + $0x18] sm:$0xff]  ;;  %v231_v19 = vld [vmem:[%s890_s24 + $0x10] sm:$0xff]  ;;  %v230_v20 = vld [vmem:[%s890_s24 + $0x8] sm:$0xff]  ;;  %v421_v43 = vstv %s420_s13 }
  0x1e   : > { %v229_v21 = vld [vmem:[%s890_s24] sm:$0xff]  ;;  %s723_s24 = scalar_lea.vmem %s517_s16, 16 }
  0x1f   : > { %629 = vmatpush3.xpose.msk.msra.mxu0 %vm269_vm0, %v243_v7  ;;  %p724_p11 = scmp.ne.s32.totalorder %s517_s16, %s723_s24  ;;  %p731_p1 = scmp.lt.s32.totalorder %s729_s7, %s723_s24 }
  0x20   : > { %630 = vmatprep.subr.msk.mxu0 %vm269_vm0, %v242_v8 }
  0x21   : > { %p725_p12 = pnand %p724_p11, %p857_p5  ;;  %p732_p2 = por %p731_p1, %p730_p0 }
  0x23   : > { %631 = vmatpush3.xpose.msk.msra.mxu0 %vm269_vm0, %v242_v8  ;;  %p726_p13 = pneg %p725_p12 }
  0x24   : > { %632 = vmatprep.subr.msk.mxu0 %vm269_vm0, %v241_v9 }
  0x25   : > { %p733_p3 = pnand %p732_p2, %p726_p13 }
  0x27   : > { %633 = vmatpush3.xpose.msk.msra.mxu0 %vm269_vm0, %v241_v9 }
  0x28   : > { %634 = vmatprep.subr.msk.mxu0 %vm269_vm0, %v240_v10 }
  0x2b   : > { %635 = vmatpush3.xpose.msk.msra.mxu0 %vm269_vm0, %v240_v10 }
  0x2c   : > { %636 = vmatprep.subr.msk.mxu0 %vm269_vm0, %v239_v11 }
  0x2f   : > { %637 = vmatpush3.xpose.msk.msra.mxu0 %vm269_vm0, %v239_v11 }
  0x30   : > { %638 = vmatprep.subr.msk.mxu0 %vm269_vm0, %v238_v12 }
  0x33   : > { %639 = vmatpush3.xpose.msk.msra.mxu0 %vm269_vm0, %v238_v12 }
  0x34   : > { %640 = vmatprep.subr.msk.mxu0 %vm269_vm0, %v237_v13 }
  0x37   : > { %641 = vmatpush3.xpose.msk.msra.mxu0 %vm269_vm0, %v237_v13 }
  0x38   : > { %642 = vmatprep.subr.msk.mxu0 %vm269_vm0, %v236_v14 }
  0x3b   : > { %643 = vmatpush3.xpose.msk.msra.mxu0 %vm269_vm0, %v236_v14 }
  0x3c   : > { %644 = vmatprep.subr.msk.mxu0 %vm269_vm0, %v235_v15 }
  0x3f   : > { %645 = vmatpush3.xpose.msk.msra.mxu0 %vm269_vm0, %v235_v15 }
  0x40   : > { %646 = vmatprep.subr.msk.mxu0 %vm269_vm0, %v234_v16 }
  0x43   : > { %647 = vmatpush3.xpose.msk.msra.mxu0 %vm269_vm0, %v234_v16 }
  0x44   : > { %648 = vmatprep.subr.msk.mxu0 %vm269_vm0, %v233_v17 }
  0x47   : > { %649 = vmatpush3.xpose.msk.msra.mxu0 %vm269_vm0, %v233_v17 }
  0x48   : > { %650 = vmatprep.subr.msk.mxu0 %vm269_vm0, %v232_v18 }
  0x4b   : > { %651 = vmatpush3.xpose.msk.msra.mxu0 %vm269_vm0, %v232_v18 }
  0x4c   : > { %652 = vmatprep.subr.msk.mxu0 %vm269_vm0, %v231_v19 }
  0x4f   : > { %653 = vmatpush3.xpose.msk.msra.mxu0 %vm269_vm0, %v231_v19 }
  0x50   : > { %654 = vmatprep.subr.msk.mxu0 %vm269_vm0, %v230_v20 }
  0x53   : > { %655 = vmatpush3.xpose.msk.msra.mxu0 %vm269_vm0, %v230_v20 }
  0x54   : > { %656 = vmatprep.subr.msk.mxu0 %vm269_vm0, %v229_v21 }
  0x57   : > { %657 = vmatpush3.xpose.msk.msra.mxu0 %vm269_vm0, %v229_v21 }
  0x5a   : > { %659 = vmatmul.mubr.msk.f32.vlgmr.msra.gmra.mxu0 %vm269_vm0, %v226_v22 }
  0x5b   : > { %661 = vmatprep.mubr.msk.f32.mxu0 %vm269_vm0, %v227_v23 }
  0x5e   : > { %662 = vmatmul.mubr.msk.f32.gmra.mxu0 %vm269_vm0, %v228_v24 }
  0x92   : > { %v257_v27 = vpop.permute.xlu1 %256 }
  0x93   : > { %v267_v26 = vpop.permute.xlu0 %266 }
  0x96   : > { %v252_v33 = vpop.permute.xlu1 %251 }
  0x97   : > { %v262_v31 = vpop.permute.xlu0 %261 }
 0x11a   : > { %v660_v28 = vpop.f32.mrf.mxu0 }
 0x11b   : > { %v402_v35 = vadd.f32 %v660_v28, %v257_v27 }
 0x11c   : > { %v396_v29 = vpop.f32.mrf.mxu0 }
 0x11d   : > { %v397_v38 = vadd.f32 %v396_v29, %v252_v33  ;;  %v416_v40 = vmax.f32 %v402_v35, 0.0 }
 0x11e   : > { %v663_v30 = vpop.f32.mrf.mxu0 }
 0x11f   : > { %v412_v32 = vadd.f32 %v663_v30, %v267_v26  ;;  %v415_v41 = vmax.f32 %v397_v38, 0.0 }
 0x120   : > { %v406_v34 = vpop.f32.mrf.mxu0 }
 0x121   : > { %v418_v36 = vmax.f32 %v412_v32, 0.0  ;;  %v407_v37 = vadd.f32 %v406_v34, %v262_v31 }
 0x123   : > { %v417_v39 = vmax.f32 %v407_v37, 0.0  ;;  %665 = vmatpush3.msra.mxu1 %v418_v36 }
 0x124   : > { %666 = vmatprep.subr.mxu1 %v786_v25 }
 0x125   : > { %667 = vmatpush3.msra.mxu1 %v417_v39 }
 0x126   : > { %668 = vmatprep.subr.mxu1 %v786_v25 }
 0x127   : > { %669 = vmatpush3.msra.mxu1 %v416_v40 }
 0x128   : > { %670 = vmatprep.subr.mxu1 %v786_v25 }
 0x129   : > { %671 = vmatpush3.msra.mxu1 %v415_v41 }
 0x12a   : > { %673 = vmatmul.mubr.msk.f32.vlgmr.msra.gmra.mxu1 %vm422_vm2, %v419_v42 }
 0x1ea   : > { %v492_v44 = vpop.f32.mrf.mxu1 }
 0x1eb   : > { %v493_v45 = vadd.f32 %v492_v44, %v421_v43 }
 0x1ec   : > { %v674_v46 = vpop.f32.mrf.mxu1 }
 0x1ed   : > { %v496_v47 = vsub.f32 0.0, %v493_v45 }
 0x1ef   : > { %v497_v48 = vmul.f32 1.442695, %v496_v47 }
 0x1f1   : > { %719 = vpow2.f32 %v497_v48 }
 0x1fe   : > { %v720_v49 = vpop.eup %719 }
 0x1ff   : > { %v499_v50 = vadd.f32 1.0, %v720_v49 }
 0x201   : > { %721 = vrcp.f32 %v499_v50 }
 0x20e   : > { %v722_v51 = vpop.eup %721 }
 0x20f   : > { %502 = vst [vmem:[%s218_s15] sm:$0x1] %v722_v51 }
 0x210   : > { %736 = shalt.err (!%p733_p3)
}
 0x211   : > { %s737_s6 = scalar_lea.hbm %s960_s19, 16  ;;  %s741_s10 = scalar_lea.hbm %s1000_s5, 48 }
 0x212   : > { %p738_p4 = scmp.ne.s32.totalorder %s960_s19, %s737_s6  ;;  %p742_p9 = scmp.lt.s32.totalorder %s960_s19, %s1000_s5 }
 0x213   : > { %p743_p10 = scmp.lt.s32.totalorder %s741_s10, %s737_s6 }
 0x214   : > { %p739_p7 = pnand %p738_p4, %p857_p5 }
 0x215   : > { %p744_p11 = por %p743_p10, %p742_p9 }
 0x216   : > { %p740_p8 = pneg %p739_p7 }
 0x218   : > { %p745_p12 = pnand %p744_p11, %p740_p8 }
 0x21a   : > { %748 = shalt.err (!%p745_p12)
}
 0x21b   : > { %675 = dma.vmem_to_hbm [thread:$0]  (%p857_p5), %s517_s16, 16, %s960_s19, %s504_s4  }
 0x21c PF: > { %p681_p13 = scmp.ge.s32.totalorder %s783_s23, 2  ;;  %s528_s13 = sand.u32 1, %s771_s20  }
 0x21d   : > { %s529_s14 = scalar_lea.sflag [#allocation4], %s528_s13 }
 0x21e   : > { %p678_p0 = pnand %p681_p13, %p861_p6 }
 0x220   : > { %p679_p1 = pneg %p678_p0 }
 0x222   : > { %766 = dma.done.wait (%p679_p1), %s529_s14, 16  }
 0x223   : > { %768 = vsyncadd (%p679_p1), %s529_s14, 4294967280  ;;  %p16_p2 = scmp.ge.s32.totalorder %s845_s25, 5   ;;  %s1003_s20 = smov %s775_s21 }
 0x224   : > { %s1004_s21 = smov %s779_s22  ;;  %s1005_s22 = smov %s855_s28 }
 0x225   : > { %s1006_s23 = smov %s845_s25  ;;  %18 = sbr.rel (!%p16_p2) target bundleno = 5 (0x5), region = 75 }
 0x22a   :  { %533 = vsyncpa [#allocation4], 1 }
 0x22b   :  { %535 = vsyncpa [#allocation4 + $0x1], 1 }

</bundles_post_ra>
